<compile_context>
chip_gen: v5e
topology: v5e:2x2
jax: 0.10.0
libtpu: 0.0.40
codegen_flags: <defaults>
</compile_context>

<pallas_src>
import jax
import jax.numpy as jnp
from jax.experimental import pallas as pl
from jax.experimental.pallas import tpu as pltpu


def _copy_kernel(x_ref, o_ref):
    o_ref[...] = x_ref[...]


def identity(x: jax.Array, *, target_block_bytes: int = 2 * 1024 * 1024) -> jax.Array:
    """torch.nn.Identity forward: y = x, as a lane-dense tiled Pallas copy."""
    orig_shape = x.shape
    n = x.size
    if n == 0:
        return x

    itemsize = jnp.dtype(x.dtype).itemsize
    # Sub-32-bit dtypes pack along sublanes: keep row counts a multiple of
    # 8 * pack so tiles stay on packed-sublane boundaries (f32->8, bf16->16,
    # int8->32).
    pack = max(1, 4 // itemsize)
    row_mult = 8 * pack

    # Lane width: widest burst-friendly multiple of 128. 1024 gives longer
    # contiguous DMAs and fewer stores per tile than a hard-coded 128.
    cols = 1024 if n >= 1024 else 128

    # Pad the flat view so (rows, cols) is lane-dense and sublane-aligned.
    quantum = row_mult * cols if n >= row_mult * cols else cols
    n_pad = pl.cdiv(n, quantum) * quantum
    flat = x.reshape(-1)
    if n_pad != n:
        flat = jnp.pad(flat, (0, n_pad - n))
    rows = n_pad // cols
    x2d = flat.reshape(rows, cols)

    if rows % row_mult == 0:
        # ~target_block_bytes per buffer; 2 in + 2 out double buffers = 4x,
        # i.e. 8 MiB at the default -> fits every generation's scoped VMEM.
        tr = max(row_mult,
                 (target_block_bytes // (cols * itemsize)) // row_mult * row_mult)
        # Guarantee >= 2 grid steps for large-enough arrays so both v7x
        # TensorCores get work under dimension_semantics=("parallel",).
        if rows >= 2 * row_mult:
            tr = min(tr, max(row_mult, (rows // 2) // row_mult * row_mult))
        tr = min(tr, rows)
    else:
        # Only possible for tiny inputs (rows < row_mult): a full-extent
        # block is always legal and trivially fits VMEM.
        tr = rows
    grid = (pl.cdiv(rows, tr),)

    out2d = pl.pallas_call(
        _copy_kernel,
        out_shape=jax.ShapeDtypeStruct((rows, cols), x.dtype),
        grid=grid,
        in_specs=[pl.BlockSpec((tr, cols), lambda i: (i, 0))],
        out_specs=pl.BlockSpec((tr, cols), lambda i: (i, 0)),
        compiler_params=pltpu.CompilerParams(
            dimension_semantics=("parallel",),
        ),
        cost_estimate=pl.CostEstimate(
            flops=0,
            transcendentals=0,
            bytes_accessed=2 * n_pad * itemsize,
        ),
    )(x2d)

    out = out2d.reshape(-1)
    if n_pad != n:
        out = out[:n]
    return out.reshape(orig_shape)


if __name__ == "__main__":
    key = jax.random.PRNGKey(0)
    # Small NCHW feature map consistent with the detection-network usage.
    x = jax.random.normal(key, (2, 4, 16, 16), dtype=jnp.float32)
    y = jax.block_until_ready(identity(x))
    assert y.shape == x.shape, f"shape mismatch: {y.shape} vs {x.shape}"
    assert y.dtype == x.dtype, f"dtype mismatch: {y.dtype} vs {x.dtype}"
    assert bool(jnp.all(y == x)), "identity output differs from input"

    # Odd-sized input exercising the lane-padding fallback (n % 128 != 0).
    x_odd = jax.random.normal(jax.random.PRNGKey(0), (3, 5, 7), dtype=jnp.float32)
    y_odd = jax.block_until_ready(identity(x_odd))
    assert y_odd.shape == x_odd.shape
    assert y_odd.dtype == x_odd.dtype
    assert bool(jnp.all(y_odd == x_odd)), "identity (padded path) differs from input"

    print("KERNEL_OK")
</pallas_src>

<mosaic_0001>
module attributes {stable_mosaic.version = 11 : i64} {
  func.func @_copy_kernel(%arg0: i32, %arg1: memref<2x1024xf32, #tpu.memory_space<vmem>>, %arg2: memref<2x1024xf32, #tpu.memory_space<vmem>>) attributes {dimension_semantics = [#tpu.dimension_semantics<parallel>], iteration_bounds = array<i64: 1>, scalar_prefetch = 0 : i64, scratch_operands = 0 : i64, tpu.core_type = #tpu.core_type<tc>, window_params = [{transform_indices = @transform_0, window_bounds = array<i64: 2, 1024>}, {transform_indices = @transform_1, window_bounds = array<i64: 2, 1024>}]} {
    %c0 = arith.constant 0 : index
    %c0_0 = arith.constant 0 : index
    %0 = vector.load %arg1[%c0, %c0_0] : memref<2x1024xf32, #tpu.memory_space<vmem>>, vector<2x1024xf32>
    %c0_1 = arith.constant 0 : index
    %c0_2 = arith.constant 0 : index
    %1 = vector.load %arg2[%c0_1, %c0_2] : memref<2x1024xf32, #tpu.memory_space<vmem>>, vector<2x1024xf32>
    tpu.vector_store %arg2[%c0_1, %c0_2], %0 {strides = array<i32>} : memref<2x1024xf32, #tpu.memory_space<vmem>>, vector<2x1024xf32>,
    return
  }
  func.func @transform_0(%arg0: i32) -> (i32, i32) {
    %c0_i32 = arith.constant 0 : i32
    %c0_i32_0 = arith.constant 0 : i32
    return %arg0, %c0_i32 : i32, i32
  }
  func.func @transform_1(%arg0: i32) -> (i32, i32) {
    %c0_i32 = arith.constant 0 : i32
    %c0_i32_0 = arith.constant 0 : i32
    return %arg0, %c0_i32 : i32, i32
  }
}

</mosaic_0001>

<bundles_post_ra>
// kernel: tpu_custom_call.1
= control target key start
LH: loop header
LB: loop body
LE: loop exit
PB: predicated region body
PF: predicated region fallthrough
CT: control target
= control target key end

     0   :  { %6 = vsyncpa [#allocation3], 0  ;;  %s116_s0 = inlined_call_operand.hbm [shape: f32[2,1024], index: 0, kind: input, shape index: {}]   ;;  %s117_s1 = inlined_call_operand.hbm [shape: f32[2,1024], index: 1, kind: output, shape index: {}]  }
   0x1   :  { %7 = vsyncpa [#allocation4], 0  ;;  %s13_s8 = sshll.u32 %s116_s0, 4  ;;  %s98_s9 = smov [#allocation2]   ;;  %s14_s8 = int_to_ptr.hbm [resolvable:$true] %s13_s8 }
   0x2   :  { %s15_s10 = sshll.u32 %s98_s9, 4  ;;  %s16_s10 = int_to_ptr.vmem [resolvable:$true] %s15_s10 }
   0x3   :  { %18 = dma.hbm_to_vmem [thread:$0]  %s14_s8, 256, %s16_s10, [#allocation3]  }
   0x4   :  { %94 = dma.done.wait [#allocation3], 256  }
   0x5   :  { %95 = vsyncadd [#allocation3], 4294967040  ;;  %s99_s11 = smov [#allocation5]   ;;  %s34_s15 = sshll.u32 %s117_s1, 4  ;;  %v23_v0 = vld [vmem:[#allocation2] sm:$0xff]  ;;  %v24_v1 = vld [vmem:[#allocation2 + $0x8] sm:$0xff]  ;;  %s35_s15 = int_to_ptr.hbm [resolvable:$true] %s34_s15 }
   0x6   :  { %s32_s12 = sshll.u32 %s99_s11, 4  ;;  %25 = vst [vmem:[#allocation5] sm:$0xff] %v23_v0  ;;  %s33_s12 = int_to_ptr.vmem [resolvable:$true] %s32_s12 }
   0x7   :  { %26 = vst [vmem:[#allocation5 + $0x8] sm:$0xff] %v24_v1 }
   0x8   :  { %37 = dma.vmem_to_hbm [thread:$0]  %s33_s12, 256, %s35_s15, [#allocation4]  }
   0x9   :  { %96 = dma.done.wait [#allocation4], 256  }
   0xa   :  { %97 = vsyncadd [#allocation4], 4294967040 }
   0xb   :  { %42 = vsyncpa [#allocation3], 1 }
   0xc   :  { %43 = vsyncpa [#allocation4], 1 }

</bundles_post_ra>
